<compile_context>
chip_gen: v7x
topology: tpu7x:2x2x1
jax: 0.10.0
libtpu: 0.0.40
codegen_flags: <defaults>
</compile_context>

<pallas_src>
import jax
import jax.numpy as jnp
from jax import lax
from jax.experimental import pallas as pl
from jax.experimental.pallas import tpu as pltpu


def _pick_images_per_step(n, slab_bytes_per_image, budget_bytes=8 << 20):
    """Largest divisor b of n keeping grid length n//b >= 2 (v7x megacore) and
    the per-step slab under the VMEM budget (v7x has only 64 MiB VMEM)."""
    best = 1
    for b in range(1, n + 1):
        if n % b:
            continue
        if b * slab_bytes_per_image > budget_bytes:
            continue
        if (n // b) >= 2 or n == 1:
            best = b
    return best


def classifier_block_forward(x_nchw, gamma, beta, conv_w, conv_b, eps=1e-5):
    """ClassifierBlock forward. x_nchw: (N, C_in, H, W); conv_w: (C_out, C_in, 5, 5)."""
    N, C_in, H, W = x_nchw.shape
    C_out = conv_w.shape[0]
    K, P = 5, 2
    assert H % 2 == 0 and W % 2 == 0, "MaxPool2d(2,2) path assumes even H, W"
    Hp, Wp = H + 2 * P, W + 2 * P
    Ho, Wo = H // 2, W // 2
    C_pad = max(8, ((C_in + 7) // 8) * 8)          # sublane-pad input channels
    KC = K * C_pad                                 # dx-group contraction dim
    L_real = Hp * Wp                               # flattened padded spatial / image
    L = ((L_real + 127) // 128) * 128              # lane-pad to a multiple of 128
    Lo = Ho * Wo                                   # pooled pixels / image
    Lo_pad = max(128, ((Lo + 127) // 128) * 128)   # lane-dense compacted output width

    # Wrap-around safety for the lane rolls: the furthest column any consumed
    # output ever reads within an image's L-lane segment is
    # (Hp-1)*Wp + (Wp-1) = L_real - 1 <= L - 1, so rolled (wrapped) data never
    # reaches a consumed column.  Keep these invariants if K, P or L change.
    assert (Hp - 1) * Wp + (Wp - 1) == L_real - 1
    assert L >= L_real

    B = _pick_images_per_step(N, KC * L * 4)       # images per grid step
    G = N // B                                     # grid length
    BL = B * L                                     # lane width per step

    x = x_nchw.astype(jnp.float32)

    # --- BatchNorm2d training-mode batch stats (tiny wrapper glue).
    # TODO(synk): PyTorch training-mode BN also updates running_mean/var
    # buffers; only the forward output is produced here.
    mean = jnp.mean(x, axis=(0, 2, 3))
    var = jnp.mean((x - mean.reshape(1, C_in, 1, 1)) ** 2, axis=(0, 2, 3))   # biased
    scale = gamma / jnp.sqrt(var + eps)
    shift = beta - mean * scale
    scale_col = jnp.pad(scale, (0, C_pad - C_in)).reshape(C_pad, 1).astype(jnp.float32)
    shift_col = jnp.pad(shift, (0, C_pad - C_in)).reshape(C_pad, 1).astype(jnp.float32)

    # Interior (non-halo) mask over the flattened padded spatial axis, folded
    # into the BN shift so the conv sees a zero-padded *normalized* image.
    interior = jnp.pad(jnp.ones((H, W), jnp.float32), ((P, P), (P, P)))
    mask = jnp.pad(interior.reshape(1, L_real), ((0, 0), (0, L - L_real)))   # (1, L)
    shift_masked = jnp.tile(shift_col * mask, (1, B))                        # (C_pad, BL)

    # --- Input: (N,C,H,W) -> (G, C_pad, B*L): channels on sublanes, B images
    # concatenated on the lane axis.
    # TODO(synk): for large inputs this wrapper pre-pad is an extra HBM round
    # trip; fuse with the upstream producer or zero the halo in-kernel.
    xp = jnp.pad(x, ((0, 0), (0, C_pad - C_in), (P, P), (P, P)))             # zero halo
    x_flat = jnp.pad(xp.reshape(N, C_pad, L_real), ((0, 0), (0, 0), (0, L - L_real)))
    x_in = (x_flat.reshape(G, B, C_pad, L)
            .transpose(0, 2, 1, 3)
            .reshape(G, C_pad, BL))

    # --- Conv weights grouped by dx: w_g[dx, co, dy*C_pad + c] = conv_w[co, c, dy, dx]
    w_t = jnp.transpose(conv_w, (3, 0, 2, 1)).astype(jnp.float32)            # (dx, O, dy, I)
    w_t = jnp.pad(w_t, ((0, 0), (0, 0), (0, 0), (0, C_pad - C_in)))
    w_g = w_t.reshape(K, C_out, KC)
    bias_col = conv_b.reshape(C_out, 1).astype(jnp.float32)

    # --- One-hot selection matrix gathering the pooled (even-y, even-x) columns.
    jj = jnp.arange(Lo, dtype=jnp.int32)
    src_cols = (2 * (jj // Wo)) * Wp + 2 * (jj % Wo)
    sel = jnp.zeros((L, Lo_pad), jnp.float32).at[src_cols, jj].set(1.0)

    def kernel(scale_ref, shiftm_ref, w_ref, bias_ref, sel_ref, x_ref, o_ref, slab_ref):
        # BatchNorm in f32; halo / lane-padding columns stay exactly 0 because
        # x is zero-padded and shift_masked is zero outside the interior.
        xn = x_ref[0] * scale_ref[...] + shiftm_ref[...]                     # (C_pad, BL)

        # dy-slab: 5 row-shifted copies of the normalized image.  Sublane
        # offsets are multiples of 8 -> full-tile unmasked f32 stores.
        for dy in range(K):
            src = xn if dy == 0 else pltpu.roll(xn, shift=BL - dy * Wp, axis=1)
            slab_ref[pl.ds(dy * C_pad, C_pad), :] = src

        # Conv2d(5x5, pad=2) as 5 dx-group MXU matmuls (f32 accumulation),
        # combined with 4 small lane rolls of the (C_out, BL) partials.
        y = jnp.dot(w_ref[0], slab_ref[...], preferred_element_type=jnp.float32)
        for dx in range(1, K):
            p = jnp.dot(w_ref[dx], slab_ref[...], preferred_element_type=jnp.float32)
            y = y + pltpu.roll(p, shift=BL - dx, axis=1)

        # Bias + ReLU + fused 2x2/2 max-pool (two roll+max passes): after this,
        # columns at even (y, x) of the padded grid hold the pooled values.
        y = jnp.maximum(y + bias_ref[...], 0.0)
        y = jnp.maximum(y, pltpu.roll(y, shift=BL - 1, axis=1))
        y = jnp.maximum(y, pltpu.roll(y, shift=BL - Wp, axis=1))

        # Compact in-kernel: per image, gather the Ho*Wo pooled columns with a
        # one-hot selection matmul on the otherwise-idle MXU, keeping the
        # output store lane-dense and shrinking HBM writeback ~L/Lo_pad x.
        for b in range(B):
            yb = y[:, b * L:(b + 1) * L]                 # lane-tile-aligned static slice
            o_ref[0, b] = jnp.dot(yb, sel_ref[...], preferred_element_type=jnp.float32)

    out = pl.pallas_call(
        kernel,
        out_shape=jax.ShapeDtypeStruct((G, B, C_out, Lo_pad), jnp.float32),
        grid=(G,),
        in_specs=[
            pl.BlockSpec((C_pad, 1), lambda g: (0, 0)),           # BN scale
            pl.BlockSpec((C_pad, BL), lambda g: (0, 0)),          # BN shift * interior mask
            pl.BlockSpec((K, C_out, KC), lambda g: (0, 0, 0)),    # dx-grouped conv weights
            pl.BlockSpec((C_out, 1), lambda g: (0, 0)),           # conv bias
            pl.BlockSpec((L, Lo_pad), lambda g: (0, 0)),          # pooled-column selector
            pl.BlockSpec((1, C_pad, BL), lambda g: (g, 0, 0)),    # B images / step
        ],
        out_specs=pl.BlockSpec((1, B, C_out, Lo_pad), lambda g: (g, 0, 0, 0)),
        scratch_shapes=[pltpu.VMEM((KC, BL), jnp.float32)],       # dy-slab (matmul RHS)
        compiler_params=pltpu.CompilerParams(
            dimension_semantics=("parallel",)),
    )(scale_col, shift_masked, w_g, bias_col, sel, x_in)

    # Layout plumbing only: contiguous slice + reshape (no strided gather).
    out = out.reshape(N, C_out, Lo_pad)[:, :, :Lo].reshape(N, C_out, Ho, Wo)
    return out


def _reference_forward(x_nchw, gamma, beta, conv_w, conv_b, eps=1e-5):
    """Pure-JAX reference mirroring the PyTorch module (training-mode BN)."""
    mean = jnp.mean(x_nchw, axis=(0, 2, 3), keepdims=True)
    var = jnp.mean((x_nchw - mean) ** 2, axis=(0, 2, 3), keepdims=True)
    xn = (x_nchw - mean) / jnp.sqrt(var + eps)
    xn = xn * gamma.reshape(1, -1, 1, 1) + beta.reshape(1, -1, 1, 1)
    y = lax.conv_general_dilated(xn, conv_w, window_strides=(1, 1),
                                 padding=((2, 2), (2, 2)),
                                 dimension_numbers=('NCHW', 'OIHW', 'NCHW'))
    y = y + conv_b.reshape(1, -1, 1, 1)
    y = jnp.maximum(y, 0.0)
    y = lax.reduce_window(y, -jnp.inf, lax.max,
                          window_dimensions=(1, 1, 2, 2),
                          window_strides=(1, 1, 2, 2), padding='VALID')
    return y


if __name__ == "__main__":
    N, C_in, C_out, H, W = 2, 4, 8, 16, 16
    key = jax.random.PRNGKey(0)
    kx, kg, kb, kw, kc = jax.random.split(key, 5)

    x = jax.random.normal(kx, (N, C_in, H, W), jnp.float32)
    gamma = 1.0 + 0.1 * jax.random.normal(kg, (C_in,), jnp.float32)
    beta = 0.1 * jax.random.normal(kb, (C_in,), jnp.float32)
    conv_w = 0.1 * jax.random.normal(kw, (C_out, C_in, 5, 5), jnp.float32)
    conv_b = 0.1 * jax.random.normal(kc, (C_out,), jnp.float32)

    out = classifier_block_forward(x, gamma, beta, conv_w, conv_b)
    out = jax.block_until_ready(out)

    ref = _reference_forward(x, gamma, beta, conv_w, conv_b)
    # MXU matmul precision (accumulation in f32) => modest tolerance vs pure-f32 reference.
    if not jnp.allclose(out, ref, rtol=2e-2, atol=2e-2):
        raise AssertionError("Pallas kernel output does not match JAX reference")

    print("KERNEL_OK")
</pallas_src>

<mosaic_0001>
module attributes {stable_mosaic.version = 11 : i64} {
  func.func @kernel(%arg0: i32, %arg1: memref<8x1xf32, #tpu.memory_space<vmem>>, %arg2: memref<8x512xf32, #tpu.memory_space<vmem>>, %arg3: memref<5x8x40xf32, #tpu.memory_space<vmem>>, %arg4: memref<8x1xf32, #tpu.memory_space<vmem>>, %arg5: memref<512x128xf32, #tpu.memory_space<vmem>>, %arg6: memref<1x8x512xf32, #tpu.memory_space<vmem>>, %arg7: memref<1x1x8x128xf32, #tpu.memory_space<vmem>>, %arg8: memref<40x512xf32, #tpu.memory_space<vmem>>) attributes {dimension_semantics = [#tpu.dimension_semantics<parallel>], iteration_bounds = array<i64: 2>, scalar_prefetch = 0 : i64, scratch_operands = 1 : i64, tpu.core_type = #tpu.core_type<tc>, window_params = [{pipeline_mode = #tpu.pipeline_mode<synchronous>, transform_indices = @transform_0, window_bounds = array<i64: 8, 1>}, {pipeline_mode = #tpu.pipeline_mode<synchronous>, transform_indices = @transform_1, window_bounds = array<i64: 8, 512>}, {pipeline_mode = #tpu.pipeline_mode<synchronous>, transform_indices = @transform_2, window_bounds = array<i64: 5, 8, 40>}, {pipeline_mode = #tpu.pipeline_mode<synchronous>, transform_indices = @transform_3, window_bounds = array<i64: 8, 1>}, {pipeline_mode = #tpu.pipeline_mode<synchronous>, transform_indices = @transform_4, window_bounds = array<i64: 512, 128>}, {transform_indices = @transform_5, window_bounds = array<i64: 1, 8, 512>}, {transform_indices = @transform_6, window_bounds = array<i64: 1, 1, 8, 128>}]} {
    %c0 = arith.constant 0 : index
    %c0_0 = arith.constant 0 : index
    %c0_1 = arith.constant 0 : index
    %0 = vector.load %arg6[%c0, %c0_0, %c0_1] : memref<1x8x512xf32, #tpu.memory_space<vmem>>, vector<1x8x512xf32>
    %1 = vector.shape_cast %0 : vector<1x8x512xf32> to vector<8x512xf32>
    %c0_2 = arith.constant 0 : index
    %c0_3 = arith.constant 0 : index
    %2 = vector.load %arg1[%c0_2, %c0_3] : memref<8x1xf32, #tpu.memory_space<vmem>>, vector<8x1xf32>
    %3 = vector.broadcast %2 : vector<8x1xf32> to vector<8x512xf32>
    %4 = arith.mulf %1, %3 : vector<8x512xf32>
    %c0_4 = arith.constant 0 : index
    %c0_5 = arith.constant 0 : index
    %5 = vector.load %arg2[%c0_4, %c0_5] : memref<8x512xf32, #tpu.memory_space<vmem>>, vector<8x512xf32>
    %6 = arith.addf %4, %5 : vector<8x512xf32>
    %c0_6 = arith.constant 0 : index
    %c0_7 = arith.constant 0 : index
    %7 = vector.load %arg8[%c0_6, %c0_7] : memref<40x512xf32, #tpu.memory_space<vmem>>, vector<8x512xf32>
    tpu.vector_store %arg8[%c0_6, %c0_7], %6 {strides = array<i32>} : memref<40x512xf32, #tpu.memory_space<vmem>>, vector<8x512xf32>,
    %c492_i32 = arith.constant 492 : i32
    %8 = tpu.dynamic_rotate %6 by %c492_i32 dim 1 : vector<8x512xf32>, i32 -> vector<8x512xf32>
    %c8 = arith.constant 8 : index
    %c0_8 = arith.constant 0 : index
    %9 = vector.load %arg8[%c8, %c0_8] : memref<40x512xf32, #tpu.memory_space<vmem>>, vector<8x512xf32>
    tpu.vector_store %arg8[%c8, %c0_8], %8 {strides = array<i32>} : memref<40x512xf32, #tpu.memory_space<vmem>>, vector<8x512xf32>,
    %c472_i32 = arith.constant 472 : i32
    %10 = tpu.dynamic_rotate %6 by %c472_i32 dim 1 : vector<8x512xf32>, i32 -> vector<8x512xf32>
    %c16 = arith.constant 16 : index
    %c0_9 = arith.constant 0 : index
    %11 = vector.load %arg8[%c16, %c0_9] : memref<40x512xf32, #tpu.memory_space<vmem>>, vector<8x512xf32>
    tpu.vector_store %arg8[%c16, %c0_9], %10 {strides = array<i32>} : memref<40x512xf32, #tpu.memory_space<vmem>>, vector<8x512xf32>,
    %c452_i32 = arith.constant 452 : i32
    %12 = tpu.dynamic_rotate %6 by %c452_i32 dim 1 : vector<8x512xf32>, i32 -> vector<8x512xf32>
    %c24 = arith.constant 24 : index
    %c0_10 = arith.constant 0 : index
    %13 = vector.load %arg8[%c24, %c0_10] : memref<40x512xf32, #tpu.memory_space<vmem>>, vector<8x512xf32>
    tpu.vector_store %arg8[%c24, %c0_10], %12 {strides = array<i32>} : memref<40x512xf32, #tpu.memory_space<vmem>>, vector<8x512xf32>,
    %c432_i32 = arith.constant 432 : i32
    %14 = tpu.dynamic_rotate %6 by %c432_i32 dim 1 : vector<8x512xf32>, i32 -> vector<8x512xf32>
    %c32 = arith.constant 32 : index
    %c0_11 = arith.constant 0 : index
    %15 = vector.load %arg8[%c32, %c0_11] : memref<40x512xf32, #tpu.memory_space<vmem>>, vector<8x512xf32>
    tpu.vector_store %arg8[%c32, %c0_11], %14 {strides = array<i32>} : memref<40x512xf32, #tpu.memory_space<vmem>>, vector<8x512xf32>,
    %c0_12 = arith.constant 0 : index
    %c0_13 = arith.constant 0 : index
    %c0_14 = arith.constant 0 : index
    %16 = vector.load %arg3[%c0_12, %c0_13, %c0_14] : memref<5x8x40xf32, #tpu.memory_space<vmem>>, vector<1x8x40xf32>
    %17 = vector.shape_cast %16 : vector<1x8x40xf32> to vector<8x40xf32>
    %c0_15 = arith.constant 0 : index
    %c0_16 = arith.constant 0 : index
    %18 = vector.load %arg8[%c0_15, %c0_16] : memref<40x512xf32, #tpu.memory_space<vmem>>, vector<40x512xf32>
    %cst = arith.constant dense<0.000000e+00> : vector<8x512xf32>
    %19 = tpu.matmul %17, %18, %cst {dimension_numbers = #tpu.dot_dimension_numbers<[1], [0], [0], [1], [0, 0, 1, 1], [], []>} : vector<8x40xf32>, vector<40x512xf32>, vector<8x512xf32> -> vector<8x512xf32>
    %c1 = arith.constant 1 : index
    %c0_17 = arith.constant 0 : index
    %c0_18 = arith.constant 0 : index
    %20 = vector.load %arg3[%c1, %c0_17, %c0_18] : memref<5x8x40xf32, #tpu.memory_space<vmem>>, vector<1x8x40xf32>
    %21 = vector.shape_cast %20 : vector<1x8x40xf32> to vector<8x40xf32>
    %c0_19 = arith.constant 0 : index
    %c0_20 = arith.constant 0 : index
    %22 = vector.load %arg8[%c0_19, %c0_20] : memref<40x512xf32, #tpu.memory_space<vmem>>, vector<40x512xf32>
    %cst_21 = arith.constant dense<0.000000e+00> : vector<8x512xf32>
    %23 = tpu.matmul %21, %22, %cst_21 {dimension_numbers = #tpu.dot_dimension_numbers<[1], [0], [0], [1], [0, 0, 1, 1], [], []>} : vector<8x40xf32>, vector<40x512xf32>, vector<8x512xf32> -> vector<8x512xf32>
    %c511_i32 = arith.constant 511 : i32
    %24 = tpu.dynamic_rotate %23 by %c511_i32 dim 1 : vector<8x512xf32>, i32 -> vector<8x512xf32>
    %25 = arith.addf %19, %24 : vector<8x512xf32>
    %c2 = arith.constant 2 : index
    %c0_22 = arith.constant 0 : index
    %c0_23 = arith.constant 0 : index
    %26 = vector.load %arg3[%c2, %c0_22, %c0_23] : memref<5x8x40xf32, #tpu.memory_space<vmem>>, vector<1x8x40xf32>
    %27 = vector.shape_cast %26 : vector<1x8x40xf32> to vector<8x40xf32>
    %c0_24 = arith.constant 0 : index
    %c0_25 = arith.constant 0 : index
    %28 = vector.load %arg8[%c0_24, %c0_25] : memref<40x512xf32, #tpu.memory_space<vmem>>, vector<40x512xf32>
    %cst_26 = arith.constant dense<0.000000e+00> : vector<8x512xf32>
    %29 = tpu.matmul %27, %28, %cst_26 {dimension_numbers = #tpu.dot_dimension_numbers<[1], [0], [0], [1], [0, 0, 1, 1], [], []>} : vector<8x40xf32>, vector<40x512xf32>, vector<8x512xf32> -> vector<8x512xf32>
    %c510_i32 = arith.constant 510 : i32
    %30 = tpu.dynamic_rotate %29 by %c510_i32 dim 1 : vector<8x512xf32>, i32 -> vector<8x512xf32>
    %31 = arith.addf %25, %30 : vector<8x512xf32>
    %c3 = arith.constant 3 : index
    %c0_27 = arith.constant 0 : index
    %c0_28 = arith.constant 0 : index
    %32 = vector.load %arg3[%c3, %c0_27, %c0_28] : memref<5x8x40xf32, #tpu.memory_space<vmem>>, vector<1x8x40xf32>
    %33 = vector.shape_cast %32 : vector<1x8x40xf32> to vector<8x40xf32>
    %c0_29 = arith.constant 0 : index
    %c0_30 = arith.constant 0 : index
    %34 = vector.load %arg8[%c0_29, %c0_30] : memref<40x512xf32, #tpu.memory_space<vmem>>, vector<40x512xf32>
    %cst_31 = arith.constant dense<0.000000e+00> : vector<8x512xf32>
    %35 = tpu.matmul %33, %34, %cst_31 {dimension_numbers = #tpu.dot_dimension_numbers<[1], [0], [0], [1], [0, 0, 1, 1], [], []>} : vector<8x40xf32>, vector<40x512xf32>, vector<8x512xf32> -> vector<8x512xf32>
    %c509_i32 = arith.constant 509 : i32
    %36 = tpu.dynamic_rotate %35 by %c509_i32 dim 1 : vector<8x512xf32>, i32 -> vector<8x512xf32>
    %37 = arith.addf %31, %36 : vector<8x512xf32>
    %c4 = arith.constant 4 : index
    %c0_32 = arith.constant 0 : index
    %c0_33 = arith.constant 0 : index
    %38 = vector.load %arg3[%c4, %c0_32, %c0_33] : memref<5x8x40xf32, #tpu.memory_space<vmem>>, vector<1x8x40xf32>
    %39 = vector.shape_cast %38 : vector<1x8x40xf32> to vector<8x40xf32>
    %c0_34 = arith.constant 0 : index
    %c0_35 = arith.constant 0 : index
    %40 = vector.load %arg8[%c0_34, %c0_35] : memref<40x512xf32, #tpu.memory_space<vmem>>, vector<40x512xf32>
    %cst_36 = arith.constant dense<0.000000e+00> : vector<8x512xf32>
    %41 = tpu.matmul %39, %40, %cst_36 {dimension_numbers = #tpu.dot_dimension_numbers<[1], [0], [0], [1], [0, 0, 1, 1], [], []>} : vector<8x40xf32>, vector<40x512xf32>, vector<8x512xf32> -> vector<8x512xf32>
    %c508_i32 = arith.constant 508 : i32
    %42 = tpu.dynamic_rotate %41 by %c508_i32 dim 1 : vector<8x512xf32>, i32 -> vector<8x512xf32>
    %43 = arith.addf %37, %42 : vector<8x512xf32>
    %c0_37 = arith.constant 0 : index
    %c0_38 = arith.constant 0 : index
    %44 = vector.load %arg4[%c0_37, %c0_38] : memref<8x1xf32, #tpu.memory_space<vmem>>, vector<8x1xf32>
    %45 = vector.broadcast %44 : vector<8x1xf32> to vector<8x512xf32>
    %46 = arith.addf %43, %45 : vector<8x512xf32>
    %cst_39 = arith.constant 0.000000e+00 : f32
    %47 = vector.broadcast %cst_39 : f32 to vector<8x512xf32>
    %48 = arith.maximumf %46, %47 : vector<8x512xf32>
    %c511_i32_40 = arith.constant 511 : i32
    %49 = tpu.dynamic_rotate %48 by %c511_i32_40 dim 1 : vector<8x512xf32>, i32 -> vector<8x512xf32>
    %50 = arith.maximumf %48, %49 : vector<8x512xf32>
    %c492_i32_41 = arith.constant 492 : i32
    %51 = tpu.dynamic_rotate %50 by %c492_i32_41 dim 1 : vector<8x512xf32>, i32 -> vector<8x512xf32>
    %52 = arith.maximumf %50, %51 : vector<8x512xf32>
    %c0_42 = arith.constant 0 : index
    %c0_43 = arith.constant 0 : index
    %53 = vector.load %arg5[%c0_42, %c0_43] : memref<512x128xf32, #tpu.memory_space<vmem>>, vector<512x128xf32>
    %cst_44 = arith.constant dense<0.000000e+00> : vector<8x128xf32>
    %54 = tpu.matmul %52, %53, %cst_44 {dimension_numbers = #tpu.dot_dimension_numbers<[1], [0], [0], [1], [0, 0, 1, 1], [], []>} : vector<8x512xf32>, vector<512x128xf32>, vector<8x128xf32> -> vector<8x128xf32>
    %c0_45 = arith.constant 0 : index
    %c0_46 = arith.constant 0 : index
    %c0_47 = arith.constant 0 : index
    %c0_48 = arith.constant 0 : index
    %55 = vector.load %arg7[%c0_45, %c0_46, %c0_47, %c0_48] : memref<1x1x8x128xf32, #tpu.memory_space<vmem>>, vector<1x1x8x128xf32>
    %56 = vector.shape_cast %55 : vector<1x1x8x128xf32> to vector<8x128xf32>
    %57 = vector.shape_cast %54 : vector<8x128xf32> to vector<1x1x8x128xf32>
    tpu.vector_store %arg7[%c0_45, %c0_46, %c0_47, %c0_48], %57 {strides = array<i32>} : memref<1x1x8x128xf32, #tpu.memory_space<vmem>>, vector<1x1x8x128xf32>,
    return
  }
  func.func @transform_0(%arg0: i32) -> (i32, i32) {
    %c0_i32 = arith.constant 0 : i32
    %c0_i32_0 = arith.constant 0 : i32
    %c0_i32_1 = arith.constant 0 : i32
    return %c0_i32, %c0_i32_0 : i32, i32
  }
  func.func @transform_1(%arg0: i32) -> (i32, i32) {
    %c0_i32 = arith.constant 0 : i32
    %c0_i32_0 = arith.constant 0 : i32
    %c0_i32_1 = arith.constant 0 : i32
    return %c0_i32, %c0_i32_0 : i32, i32
  }
  func.func @transform_2(%arg0: i32) -> (i32, i32, i32) {
    %c0_i32 = arith.constant 0 : i32
    %c0_i32_0 = arith.constant 0 : i32
    %c0_i32_1 = arith.constant 0 : i32
    %c0_i32_2 = arith.constant 0 : i32
    return %c0_i32, %c0_i32_0, %c0_i32_1 : i32, i32, i32
  }
  func.func @transform_3(%arg0: i32) -> (i32, i32) {
    %c0_i32 = arith.constant 0 : i32
    %c0_i32_0 = arith.constant 0 : i32
    %c0_i32_1 = arith.constant 0 : i32
    return %c0_i32, %c0_i32_0 : i32, i32
  }
  func.func @transform_4(%arg0: i32) -> (i32, i32) {
    %c0_i32 = arith.constant 0 : i32
    %c0_i32_0 = arith.constant 0 : i32
    %c0_i32_1 = arith.constant 0 : i32
    return %c0_i32, %c0_i32_0 : i32, i32
  }
  func.func @transform_5(%arg0: i32) -> (i32, i32, i32) {
    %c0_i32 = arith.constant 0 : i32
    %c0_i32_0 = arith.constant 0 : i32
    %c0_i32_1 = arith.constant 0 : i32
    return %arg0, %c0_i32, %c0_i32_0 : i32, i32, i32
  }
  func.func @transform_6(%arg0: i32) -> (i32, i32, i32, i32) {
    %c0_i32 = arith.constant 0 : i32
    %c0_i32_0 = arith.constant 0 : i32
    %c0_i32_1 = arith.constant 0 : i32
    %c0_i32_2 = arith.constant 0 : i32
    return %arg0, %c0_i32, %c0_i32_0, %c0_i32_1 : i32, i32, i32, i32
  }
}

</mosaic_0001>

<bundles_post_ra>
// kernel: tpu_custom_call.1
= control target key start
LH: loop header
LB: loop body
LE: loop exit
PB: predicated region body
PF: predicated region fallthrough
CT: control target
= control target key end

     0   :  { %11 = vsyncpa [#allocation4], 0  ;;  %s2693_s0 = inlined_call_operand.vmem [shape: f32[8,1], index: 0, kind: input, shape index: {}]   ;;  %s2694_s1 = inlined_call_operand.hbm [shape: f32[8,512], index: 1, kind: input, shape index: {}]   ;;  %s2695_s2 = inlined_call_operand.hbm [shape: f32[5,8,40], index: 2, kind: input, shape index: {}]   ;;  %s2696_s3 = inlined_call_operand.vmem [shape: f32[8,1], index: 3, kind: input, shape index: {}]   ;;  %s2697_s4 = inlined_call_operand.hbm [shape: f32[512,128], index: 4, kind: input, shape index: {}]   ;;  %s2698_s5 = inlined_call_operand.hbm [shape: f32[2,8,512], index: 5, kind: input, shape index: {}]   ;;  %s2699_s6 = inlined_call_operand.hbm [shape: f32[2,1,8,128], index: 6, kind: output, shape index: {}]  }
   0x1   :  { %12 = vsyncpa [#allocation7], 0 }
   0x2   :  { %13 = vsyncpa [#allocation10], 0 }
   0x3   :  { %15 = vsyncpa [#allocation10 + $0x1], 0 }
   0x4   :  { %16 = vsyncpa [#allocation5], 0 }
   0x5   :  { %18 = vsyncpa [#allocation5 + $0x1], 0  ;;  %s2218_s21 = smov 0   ;;  %s2220_s22 = smov 0  }
   0x6   :  { %s2222_s23 = smov 0   ;;  %s2224_s24 = smov 0  }
   0x7 LB: > { %s2239_s25 = sadd.s32 4294967295, %s2164_s24   ;;  %s1591_s26 = sadd.s32 4294967294, %s2164_s24   ;;  %s2164_s24 = sphi %s2224_s24, %s2722_s24   ;;  %s2160_s23 = sphi %s2222_s23, %s2721_s23   ;;  %s2156_s22 = sphi %s2220_s22, %s2720_s22   ;;  %s2152_s21 = sphi %s2218_s21, %s2719_s21  }
   0x8   : > { %p149_p0 = scmp.ne.s32.totalorder %s2156_s22, %s2152_s21  ;;  %p2700_p1 = scmp.eq.s32.totalorder %s2239_s25, 0 }
   0x9   : > { %p179_p3 = scmp.eq.s32.totalorder %s1591_s26, 1  ;;  %p1592_p5 = scmp.ge.s32.totalorder %s2164_s24, 1 }
   0xa   : > { %p2248_p4 = por %p2700_p1, %p149_p0  ;;  %p186_p7 = scmp.lt.s32.totalorder %s2164_s24, 3 }
   0xb   : > { %p2253_p6 = por %p179_p3, %p149_p0  ;;  %s2166_s30 = smov [#allocation6]  }
   0xc   : > { %s2703_s27 = scalar_select %p2248_p4, 1, 0 }
   0xd   : > { %s2704_s28 = scalar_select %p2253_p6, 1, 0 }
   0xe   : > { %p2258_p8 = pnand %p1592_p5, %p186_p7  ;;  %s212_s7 = sshll.u32 %s2166_s30, 4  ;;  %s2262_s7 = int_to_ptr.vmem [resolvable:$true] %s212_s7 }
   0xf   : > { %s2167_s9 = smov [#allocation3]   ;;  %s2168_s11 = smov [#allocation8]  }
  0x10   : > { %s2705_s29 = scalar_select %p2258_p8, 1, 0 }
  0x11   : > { %p1851_p9 = pneg %p2258_p8  ;;  %s202_s10 = sshll.u32 %s2167_s9, 4  ;;  %s2273_s10 = int_to_ptr.vmem [resolvable:$true] %s202_s10 }
  0x12   : > { %s2275_s12 = sshll.u32 %s2168_s11, 4  ;;  %s1976_s15 = scalar_lea.hbm %s2695_s2, 640  ;;  %s229_s12 = int_to_ptr.vmem [resolvable:$true] %s2275_s12 }
  0x13   : > { %p2269_p11 = pnand %p1851_p9, %p2700_p1  ;;  %p1977_p12 = scmp.ne.s32.totalorder %s2695_s2, %s1976_s15 }
  0x14   : > { %p1983_p5 = scmp.lt.u32.totalorder %s1976_s15, %s2695_s2 }
  0x15   : > { %p2285_p13 = pneg %p2269_p11 }
  0x17   : > { %p1979_p0 = pnand %p2285_p13, %p1977_p12 }
  0x19   : > { %p1980_p3 = pneg %p1979_p0 }
  0x1b   : > { %p1985_p7 = pnand %p1983_p5, %p1980_p3 }
  0x1d   : > { %1988 = shalt.err (!%p1985_p7)
}
  0x1e   : > { %s1989_s26 = scalar_lea.vmem %s2262_s7, 640  ;;  %p1997_p2 = scmp.lt.s32.totalorder %s2262_s7, %s2262_s7 }
  0x1f   : > { %p1990_p9 = scmp.ne.s32.totalorder %s2262_s7, %s1989_s26  ;;  %p1998_p6 = scmp.lt.s32.totalorder %s1989_s26, %s1989_s26 }
  0x21   : > { %p1992_p10 = pnand %p1990_p9, %p2285_p13  ;;  %p1999_p12 = por %p1998_p6, %p1997_p2 }
  0x23   : > { %p1993_p1 = pneg %p1992_p10 }
  0x25   : > { %p2000_p0 = pnand %p1999_p12, %p1993_p1 }
  0x27   : > { %2003 = shalt.err (!%p2000_p0)
}
  0x28   : > { %s2169_s30 = smov 128   ;;  %s2170_s9 = smov 8  }
  0x29   : > { %1857 = dma.hbm_to_vmem [thread:$0]  (!%p2269_p11), %s2695_s2, 640, %s2262_s7, [#allocation7], %s2169_s30, %s2169_s30, %s2170_s9  }
  0x2a   : > { %s2004_s16 = scalar_lea.hbm %s2694_s1, 512 }
  0x2b   : > { %p2005_p1 = scmp.ne.s32.totalorder %s2694_s1, %s2004_s16  ;;  %p2011_p10 = scmp.lt.u32.totalorder %s2004_s16, %s2694_s1 }
  0x2d   : > { %p2007_p2 = pnand %p2005_p1, %p2285_p13 }
  0x2f   : > { %p2008_p6 = pneg %p2007_p2 }
  0x31   : > { %p2013_p3 = pnand %p2011_p10, %p2008_p6 }
  0x33   : > { %2016 = shalt.err (!%p2013_p3)
}
  0x34   : > { %s2017_s7 = scalar_lea.vmem %s2273_s10, 512  ;;  %p2025_p12 = scmp.lt.s32.totalorder %s2273_s10, %s2273_s10 }
  0x35   : > { %p2018_p5 = scmp.ne.s32.totalorder %s2273_s10, %s2017_s7  ;;  %p2026_p0 = scmp.lt.s32.totalorder %s2017_s7, %s2017_s7 }
  0x37   : > { %p2020_p7 = pnand %p2018_p5, %p2285_p13  ;;  %p2027_p1 = por %p2026_p0, %p2025_p12 }
  0x39   : > { %p2021_p9 = pneg %p2020_p7 }
  0x3b   : > { %p2028_p2 = pnand %p2027_p1, %p2021_p9 }
  0x3d   : > { %2031 = shalt.err (!%p2028_p2)
}
  0x3e   : > { %1854 = dma.hbm_to_vmem [thread:$0]  (!%p2269_p11), %s2694_s1, 512, %s2273_s10, [#allocation4]  }
  0x3f   : > { %s2032_s16 = scalar_lea.hbm %s2697_s4, 8192 }
  0x40   : > { %p2033_p6 = scmp.ne.s32.totalorder %s2697_s4, %s2032_s16  ;;  %p2039_p5 = scmp.lt.u32.totalorder %s2032_s16, %s2697_s4 }
  0x42   : > { %p2035_p10 = pnand %p2033_p6, %p2285_p13 }
  0x44   : > { %p2036_p3 = pneg %p2035_p10 }
  0x46   : > { %p2041_p7 = pnand %p2039_p5, %p2036_p3 }
  0x48   : > { %2044 = shalt.err (!%p2041_p7)
}
  0x49   : > { %s2045_s7 = scalar_lea.vmem %s229_s12, 8192  ;;  %p2053_p1 = scmp.lt.s32.totalorder %s229_s12, %s229_s12 }
  0x4a   : > { %p2046_p9 = scmp.ne.s32.totalorder %s229_s12, %s2045_s7  ;;  %p2054_p2 = scmp.lt.s32.totalorder %s2045_s7, %s2045_s7 }
  0x4c   : > { %p2048_p12 = pnand %p2046_p9, %p2285_p13  ;;  %p2055_p4 = por %p2054_p2, %p2053_p1 }
  0x4e   : > { %p2049_p0 = pneg %p2048_p12 }
  0x50   : > { %p2056_p8 = pnand %p2055_p4, %p2049_p0 }
  0x52   : > { %2059 = shalt.err (!%p2056_p8)
}
  0x53   : > { %1860 = dma.hbm_to_vmem [thread:$0]  (!%p2269_p11), %s2697_s4, 8192, %s229_s12, [#allocation7], %s2169_s30, %s2169_s30, %s2170_s9  }
  0x54   : > { %s2355_s18 = sadd.s32 1, %s2164_s24   ;;  %s136_s13 = sadd.s32 1, %s2160_s23 }
  0x55   : > { %s133_s8 = ssub.s32 %s2164_s24, %s2355_s18  ;;  %p143_p8 = scmp.ne.s32.totalorder %s2160_s23, %s2156_s22 }
  0x56   : > { %p134_p4 = scmp.eq.s32.totalorder %s133_s8, 0  ;;  %p144_p13 = scmp.eq.s32.totalorder %s2164_s24, 0 }
  0x57   : > { %p1872_p6 = scmp.lt.s32.totalorder %s2164_s24, 2  ;;  %p2708_p3 = scmp.eq.s32.totalorder %s2239_s25, 1 }
  0x58   : > { %s2365_s14 = scalar_select %p134_p4, %s2160_s23, %s136_s13  }
  0x59   : > { %p145_p10 = por %p144_p13, %p143_p8  ;;  %p2369_p5 = por %p2708_p3, %p143_p8 }
  0x5a   : > { %s242_s16 = sand.u32 1, %s2160_s23   ;;  %s1620_s17 = sshll.u32 %s2164_s24, 9 }
  0x5b   : > { %s1597_s12 = sshll.u32 %s242_s16, 5  ;;  %s2378_s19 = scalar_lea.hbm %s2698_s5, %s1620_s17 }
  0x5c   : > { %s246_s20 = scalar_lea.vmem [#allocation9], %s1597_s12  ;;  %p2380_p11 = pnand %p1872_p6, %p145_p10 }
  0x5d   : > { %s254_s26 = sshll.u32 %s246_s20, 4  ;;  %s243_s10 = scalar_lea.sflag [#allocation10], %s242_s16  ;;  %s2384_s26 = int_to_ptr.vmem [resolvable:$true] %s254_s26 }
  0x5e   : > { %s2060_s11 = scalar_lea.hbm %s2378_s19, 512  ;;  %p2062_p9 = pneg %p2380_p11 }
  0x5f   : > { %p2061_p7 = scmp.ne.s32.totalorder %s2378_s19, %s2060_s11  ;;  %s2065_s17 = scalar_lea.hbm %s2698_s5, 1024 }
  0x60   : > { %p2066_p1 = scmp.lt.u32.totalorder %s2378_s19, %s2698_s5  ;;  %p2067_p2 = scmp.lt.u32.totalorder %s2065_s17, %s2060_s11 }
  0x61   : > { %p2063_p12 = pnand %p2062_p9, %p2061_p7  ;;  %p2069_p8 = scmp.lt.u32.totalorder %s2060_s11, %s2378_s19 }
  0x62   : > { %p2068_p4 = por %p2067_p2, %p2066_p1 }
  0x63   : > { %p2064_p0 = pneg %p2063_p12 }
  0x64   : > { %p2070_p13 = por %p2069_p8, %p2068_p4 }
  0x66   : > { %p2071_p6 = pnand %p2070_p13, %p2064_p0 }
  0x68   : > { %2074 = shalt.err (!%p2071_p6)
}
  0x69   : > { %s2075_s16 = scalar_lea.vmem %s2384_s26, 512  ;;  %s2171_s9 = smov [#allocation9]  }
  0x6a   : > { %p2076_p10 = scmp.ne.s32.totalorder %s2384_s26, %s2075_s16  ;;  %s2080_s20 = sshll.u32 %s2171_s9, 4  ;;  %s2081_s20 = int_to_ptr.vmem [resolvable:$false] %s2080_s20 }
  0x6b   : > { %s2082_s8 = scalar_lea.vmem %s2081_s20, 1024  ;;  %p2083_p12 = scmp.lt.s32.totalorder %s2384_s26, %s2081_s20 }
  0x6c   : > { %p2078_p3 = pnand %p2076_p10, %p2062_p9  ;;  %p2084_p1 = scmp.lt.s32.totalorder %s2082_s8, %s2075_s16 }
  0x6e   : > { %p2079_p7 = pneg %p2078_p3  ;;  %p2085_p2 = por %p2084_p1, %p2083_p12 }
  0x70   : > { %p2086_p4 = pnand %p2085_p2, %p2079_p7 }
  0x72   : > { %2089 = shalt.err (!%p2086_p4)
}
  0x73   : > { %1864 = dma.hbm_to_vmem [thread:$0]  (!%p2380_p11), %s2378_s19, 512, %s2384_s26, %s243_s10  }
  0x74   : > { %p2711_p0 = scmp.ne.s32.totalorder %s2705_s29, 0 }
  0x75   : > { %p2712_p9 = scmp.eq.s32.totalorder (!%p2711_p0), %s2239_s25, 0 }
  0x76   : > { %263 = sbr.rel (%p2711_p0) target bundleno = 1263 (0x4ef), region = 44 }
  0x7d   : > { %2135 = dma.done.wait (%p2712_p9), [#allocation4], 512   ;;  %p2713_p8 = pmov %p2712_p9 }
  0x7f   : > { %2137 = vsyncadd (%p2713_p8), [#allocation4], 4294966784  ;;  %p2714_p13 = pmov %p2713_p8 }
  0x80   : > { %p2715_p6 = pmov %p2713_p8 }
  0x81   : > { %2139 = dma.done.wait (%p2714_p13), [#allocation7], 8832  }
  0x82   : > { %2141 = vsyncadd (%p2715_p6), [#allocation7], 4294958464  ;;  %s2422_s7 = sand.u32 1, %s2156_s22   ;;  %p2716_p11 = scmp.ne.s32.totalorder %s2703_s27, 0 }
  0x83   : > { %s1604_s29 = sshll.u32 %s2422_s7, 5  ;;  %s278_s19 = scalar_lea.sflag [#allocation10], %s2422_s7 }
  0x84   : > { %s281_s26 = scalar_lea.vmem [#allocation9], %s1604_s29 }
  0x85   : > { %2143 = dma.done.wait (%p2716_p11), %s278_s19, 512  }
  0x86   : > { %2145 = vsyncadd (%p2716_p11), %s278_s19, 4294966784  ;;  %v2172_v0 = vmov 0   ;;  %v314_v1 = vld [vmem:[%s2693_s0] sm:$0xff]  ;;  %v310_v2 = vld [vmem:[%s281_s26] sm:$0xff]  ;;  %s2173_s27 = smov 108   ;;  %s2174_s13 = smov 88   ;;  %v344_v23 = vlaneseq }
  0x87   : > { %1924 = vset.pattern.permute.xlu0 %v2172_v0  ;;  %1955 = vset.pattern.permute.xlu1 %v2172_v0  ;;  %v311_v3 = vld [vmem:[%s281_s26 + $0x8] sm:$0xff]  ;;  %v312_v4 = vld [vmem:[%s281_s26 + $0x10] sm:$0xff]  ;;  %v313_v5 = vld [vmem:[%s281_s26 + $0x18] sm:$0xff]  ;;  %v2175_v21 = vmov 0.0   ;;  %s2176_s17 = smov 68   ;;  %s2177_s12 = smov 48  }
  0x88   : > { %317 = vperm.xlu0 %1924, %v314_v1   ;;  %v324_v6 = vld [vmem:[#allocation3] sm:$0xff]  ;;  %v325_v7 = vld [vmem:[#allocation3 + $0x8] sm:$0xff]  ;;  %v326_v8 = vld [vmem:[#allocation3 + $0x10] sm:$0xff]  ;;  %497 = vmatprep.mubr.f32.mxu0 %v2175_v21  ;;  %v2440_v24 = vand.u32 127, %v344_v23  ;;  %vm429_vm4 = vcmask 326656   ;;  %s2178_s9 = smov 127  }
  0x89   : > { %v327_v9 = vld [vmem:[#allocation3 + $0x18] sm:$0xff]  ;;  %568 = vmatprep.mubr.f32.mxu1 %v2175_v21  ;;  %s2179_s20 = smov 126   ;;  %s2180_s8 = smov 125  }
  0x8a   : > { %v1225_v22 = vld [vmem:[%s2696_s3] sm:$0xff]  ;;  %vm346_vm0 = vcmp.lt.s32.totalorder %v2440_v24, 108  ;;  %vm363_vm1 = vcmp.lt.s32.totalorder %v2440_v24, 88  ;;  %vm380_vm2 = vcmp.lt.s32.totalorder %v2440_v24, 68  ;;  %vm397_vm3 = vcmp.lt.s32.totalorder %v2440_v24, 48  ;;  %s2181_s29 = smov 124  }
  0x8b   : > { %vm583_vm5 = vcmp.lt.s32.totalorder %v2440_v24, 127  ;;  %vm888_vm6 = vcmp.lt.s32.totalorder %v2440_v24, 126  ;;  %vm1052_vm7 = vcmp.lt.s32.totalorder %v2440_v24, 125  ;;  %vm1216_vm8 = vcmp.lt.s32.totalorder %v2440_v24, 124  ;;  %s1605_s19 = sshll.u32 %s2422_s7, 3  ;;  %s1617_s26 = sshll.u32 %s2239_s25, 7 }
  0x8c   : > { %s309_s10 = scalar_lea.vmem [#allocation11], %s1605_s19  ;;  %s2182_s25 = smov [#allocation11]  }
  0x8d   : > { %s1490_s11 = sshll.u32 %s309_s10, 4  ;;  %s2094_s16 = sshll.u32 %s2182_s25, 4  ;;  %s2651_s11 = int_to_ptr.vmem [resolvable:$true] %s1490_s11  ;;  %s2095_s16 = int_to_ptr.vmem [resolvable:$false] %s2094_s16 }
  0x8e   : > { %s2090_s30 = scalar_lea.vmem %s2651_s11, 128  ;;  %p2097_p12 = scmp.lt.s32.totalorder %s2651_s11, %s2095_s16 }
  0x8f   : > { %p2091_p10 = scmp.ne.s32.totalorder %s2651_s11, %s2090_s30 }
  0x91   : > { %p2092_p3 = pnand %p2091_p10, %p2369_p5 }
  0x93   : > { %p2093_p7 = pneg %p2092_p3 }
 0x107   : > { %v318_v10 = vpop.permute.xlu0 %317 }
 0x108   : > { %v320_v11 = vmul.f32 %v318_v10, %v310_v2  ;;  %v321_v12 = vmul.f32 %v318_v10, %v311_v3  ;;  %v322_v13 = vmul.f32 %v318_v10, %v312_v4  ;;  %v323_v14 = vmul.f32 %v318_v10, %v313_v5  ;;  %v898_v10 = vld [vmem:[#allocation6 + $0x18] sm:$0xff] }
 0x10a   : > { %v328_v15 = vadd.f32 %v324_v6, %v320_v11  ;;  %v329_v16 = vadd.f32 %v325_v7, %v321_v12  ;;  %v330_v17 = vadd.f32 %v326_v8, %v322_v13  ;;  %v331_v18 = vadd.f32 %v327_v9, %v323_v14  ;;  %v428_v6 = vld [vmem:[#allocation6 + $0x8] sm:$0xff]  ;;  %v406_v8 = vld [vmem:[#allocation6] sm:$0xff]  ;;  %v734_v9 = vld [vmem:[#allocation6 + $0x10] sm:$0xff] }
 0x10b   : > { %v1062_v11 = vld [vmem:[#allocation6 + $0x20] sm:$0xff] }
 0x10c   : > { %v1930_v19 = vpack.i.bf16 %v331_v18, %v330_v17  ;;  %v1925_v20 = vpack.i.bf16 %v329_v16, %v328_v15 }
 0x10e   : > { %1931 = vrot.lane.b32.xlu1 %v1930_v19, %s2173_s27  ;;  %1926 = vrot.lane.b32.xlu0 %v1925_v20, %s2173_s27 }
 0x112   : > { %1936 = vrot.lane.b32.xlu1 %v1925_v20, %s2174_s13  ;;  %1941 = vrot.lane.b32.xlu0 %v1930_v19, %s2174_s13 }
 0x116   : > { %1946 = vrot.lane.b32.xlu1 %v1925_v20, %s2176_s17  ;;  %1951 = vrot.lane.b32.xlu0 %v1930_v19, %s2176_s17  ;;  %s2649_s17 = scalar_lea.hbm %s2699_s6, %s1617_s26 }
 0x11a   : > { %389 = vrot.lane.b32.xlu1 %v328_v15, %s2177_s12  ;;  %391 = vrot.lane.b32.xlu0 %v329_v16, %s2177_s12 }
 0x11e   : > { %393 = vrot.lane.b32.xlu1 %v330_v17, %s2177_s12  ;;  %395 = vrot.lane.b32.xlu0 %v331_v18, %s2177_s12  ;;  %s1477_s12 = scalar_lea.sflag [#allocation5], %s2422_s7 }
 0x122   : > { %1228 = vperm.xlu1 %1955, %v1225_v22  }
 0x180   : > { %v1932_v25 = vpop.permute.xlu1 %1931  ;;  %v1927_v26 = vpop.permute.xlu0 %1926 }
 0x181   : > { %v1934_v27 = vunpack.i.h.bf16 %v1932_v25  ;;  %v1933_v28 = vunpack.i.l.bf16 %v1932_v25  ;;  %v1929_v29 = vunpack.i.h.bf16 %v1927_v26  ;;  %v1928_v30 = vunpack.i.l.bf16 %v1927_v26 }
 0x183   : > { %v347_v31 = vsel %vm346_vm0, %v1933_v28, %v1934_v27  ;;  %v348_v32 = vsel %vm346_vm0, %v1929_v29, %v1933_v28  ;;  %v349_v33 = vsel %vm346_vm0, %v1928_v30, %v1929_v29  ;;  %v350_v34 = vsel %vm346_vm0, %v1934_v27, %v1928_v30 }
 0x184   : > { %v2451_v35 = vpack.c.bf16 %v347_v31, %v330_v17  ;;  %v2453_v36 = vpack.c.bf16 %v348_v32, %v329_v16  ;;  %v2455_v37 = vpack.c.bf16 %v349_v33, %v328_v15  ;;  %v2457_v38 = vpack.c.bf16 %v350_v34, %v331_v18  ;;  %v1937_v39 = vpop.permute.xlu1 %1936  ;;  %v1942_v40 = vpop.permute.xlu0 %1941 }
 0x185   : > { %v1939_v41 = vunpack.i.h.bf16 %v1937_v39  ;;  %v1938_v42 = vunpack.i.l.bf16 %v1937_v39  ;;  %v1944_v43 = vunpack.i.h.bf16 %v1942_v40  ;;  %v1943_v44 = vunpack.i.l.bf16 %v1942_v40 }
 0x186   : > { %1692 = vmatprep.subr.bf16.mxu0 %v2453_v36  ;;  %1700 = vmatprep.subr.bf16.mxu1 %v2457_v38 }
 0x187   : > { %1694 = vmatpush1.bf16.msra.mxu0 %v2455_v37  ;;  %1702 = vmatpush1.bf16.msra.mxu1 %v2451_v35  ;;  %v366_v51 = vsel %vm363_vm1, %v1938_v42, %v1939_v41  ;;  %v367_v52 = vsel %vm363_vm1, %v1944_v43, %v1938_v42  ;;  %v364_v53 = vsel %vm363_vm1, %v1943_v44, %v1944_v43 }
 0x188   : > { %v1947_v45 = vpop.permute.xlu1 %1946  ;;  %v1952_v46 = vpop.permute.xlu0 %1951  ;;  %v365_v54 = vsel %vm363_vm1, %v1939_v41, %v1943_v44 }
 0x189   : > { %v1949_v47 = vunpack.i.h.bf16 %v1947_v45  ;;  %v1948_v48 = vunpack.i.l.bf16 %v1947_v45  ;;  %v1954_v49 = vunpack.i.h.bf16 %v1952_v46  ;;  %v1953_v50 = vunpack.i.l.bf16 %v1952_v46 }
 0x18b   : > { %v383_v55 = vsel %vm380_vm2, %v1948_v48, %v1949_v47  ;;  %v384_v56 = vsel %vm380_vm2, %v1954_v49, %v1948_v48  ;;  %v381_v57 = vsel %vm380_vm2, %v1953_v50, %v1954_v49  ;;  %v382_v58 = vsel %vm380_vm2, %v1949_v47, %v1953_v50 }
 0x18c   : > { %v2465_v59 = vpack.c.bf16 %v383_v55, %v366_v51  ;;  %v2467_v60 = vpack.c.bf16 %v382_v58, %v365_v54  ;;  %v2469_v61 = vpack.c.bf16 %v384_v56, %v367_v52  ;;  %v2471_v62 = vpack.c.bf16 %v381_v57, %v364_v53  ;;  %v390_v63 = vpop.permute.xlu1 %389  ;;  %v392_v0 = vpop.permute.xlu0 %391 }
 0x18d   : > { %v2484_v7 = vsel %vm397_vm3, %v390_v63, %v392_v0 }
 0x18e   : > { %1696 = vmatprep.subr.bf16.mxu0 %v2467_v60  ;;  %1704 = vmatprep.subr.bf16.mxu1 %v2469_v61 }
 0x18f   : > { %1698 = vmatpush1.bf16.msra.mxu0 %v2465_v59  ;;  %1706 = vmatpush1.bf16.msra.mxu1 %v2471_v62 }
 0x190   : > { %v394_v1 = vpop.permute.xlu1 %393  ;;  %v396_v2 = vpop.permute.xlu0 %395 }
 0x191   : > { %v2478_v3 = vsel %vm397_vm3, %v392_v0, %v394_v1  ;;  %v2480_v4 = vsel %vm397_vm3, %v394_v1, %v396_v2  ;;  %v2482_v5 = vsel %vm397_vm3, %v396_v2, %v390_v63 }
 0x192   : > { %441 = vmatprep.subr.mxu0 %v2478_v3  ;;  %512 = vmatprep.subr.mxu1 %v2482_v5 }
 0x193   : > { %442 = vmatpush1.msra.mxu0 %v2484_v7  ;;  %513 = vmatpush1.msra.mxu1 %v2480_v4 }
 0x194   : > { %1606 = vmatmul.mubr.msk.f32.vlgmr.msra.gmra.mrb[0].mxu0 %vm429_vm4, %v428_v6  ;;  %1708 = vmatprep.subr.bf16.mxu0 %v2453_v36 }
 0x195   : > { %1716 = vmatprep.subr.bf16.mxu1 %v2457_v38  ;;  %1607 = vmatmul.mubr.msk.f32.vlgmr.msra.gmra.mrb[0].mxu1 %vm429_vm4, %v428_v6 }
 0x196   : > { %1710 = vmatpush1.bf16.msra.mxu0 %v2455_v37  ;;  %1718 = vmatpush1.bf16.msra.mxu1 %v2451_v35 }
 0x197   : > { %1712 = vmatprep.subr.bf16.mxu0 %v2467_v60  ;;  %1720 = vmatprep.subr.bf16.mxu1 %v2469_v61 }
 0x198   : > { %655 = vmatprep.mubr.f32.mxu0 %v2175_v21  ;;  %726 = vmatprep.mubr.f32.mxu1 %v2175_v21 }
 0x19a   : > { %1714 = vmatpush1.bf16.msra.mxu0 %v2465_v59  ;;  %1722 = vmatpush1.bf16.msra.mxu1 %v2471_v62 }
 0x19b   : > { %599 = vmatprep.subr.mxu0 %v2478_v3  ;;  %670 = vmatprep.subr.mxu1 %v2482_v5 }
 0x19e   : > { %600 = vmatpush1.msra.mxu0 %v2484_v7  ;;  %671 = vmatpush1.msra.mxu1 %v2480_v4 }
 0x19f   : > { %1608 = vmatmul.mubr.msk.f32.vlgmr.msra.gmra.mrb[2].mxu0 %vm429_vm4, %v406_v8  ;;  %1724 = vmatprep.subr.bf16.mxu0 %v2453_v36 }
 0x1a0   : > { %1732 = vmatprep.subr.bf16.mxu1 %v2457_v38  ;;  %1609 = vmatmul.mubr.msk.f32.vlgmr.msra.gmra.mrb[2].mxu1 %vm429_vm4, %v406_v8 }
 0x1a1   : > { %1726 = vmatpush1.bf16.msra.mxu0 %v2455_v37  ;;  %1734 = vmatpush1.bf16.msra.mxu1 %v2451_v35  ;;  %v1229_v33 = vpop.permute.xlu1 %1228 }
 0x1a2   : > { %1728 = vmatprep.subr.bf16.mxu0 %v2467_v60  ;;  %1736 = vmatprep.subr.bf16.mxu1 %v2469_v61 }
 0x1a3   : > { %802 = vmatprep.mubr.f32.mxu0 %v2175_v21  ;;  %873 = vmatprep.mubr.f32.mxu1 %v2175_v21 }
 0x1a5   : > { %1730 = vmatpush1.bf16.msra.mxu0 %v2465_v59  ;;  %1738 = vmatpush1.bf16.msra.mxu1 %v2471_v62 }
 0x1a6   : > { %746 = vmatprep.subr.mxu0 %v2478_v3  ;;  %817 = vmatprep.subr.mxu1 %v2482_v5 }
 0x1a9   : > { %747 = vmatpush1.msra.mxu0 %v2484_v7  ;;  %818 = vmatpush1.msra.mxu1 %v2480_v4 }
 0x1aa   : > { %1610 = vmatmul.mubr.msk.f32.vlgmr.msra.gmra.mrb[4].mxu0 %vm429_vm4, %v734_v9  ;;  %1740 = vmatprep.subr.bf16.mxu0 %v2453_v36 }
 0x1ab   : > { %1748 = vmatprep.subr.bf16.mxu1 %v2457_v38  ;;  %1611 = vmatmul.mubr.msk.f32.vlgmr.msra.gmra.mrb[4].mxu1 %vm429_vm4, %v734_v9 }
 0x1ac   : > { %1742 = vmatpush1.bf16.msra.mxu0 %v2455_v37  ;;  %1750 = vmatpush1.bf16.msra.mxu1 %v2451_v35 }
 0x1ad   : > { %1744 = vmatprep.subr.bf16.mxu0 %v2467_v60  ;;  %1752 = vmatprep.subr.bf16.mxu1 %v2469_v61 }
 0x1ae   : > { %966 = vmatprep.mubr.f32.mxu0 %v2175_v21  ;;  %1037 = vmatprep.mubr.f32.mxu1 %v2175_v21 }
 0x1b0   : > { %1746 = vmatpush1.bf16.msra.mxu0 %v2465_v59  ;;  %1754 = vmatpush1.bf16.msra.mxu1 %v2471_v62 }
 0x1b1   : > { %910 = vmatprep.subr.mxu0 %v2478_v3  ;;  %981 = vmatprep.subr.mxu1 %v2482_v5 }
 0x1b4   : > { %911 = vmatpush1.msra.mxu0 %v2484_v7  ;;  %982 = vmatpush1.msra.mxu1 %v2480_v4 }
 0x1b5   : > { %1612 = vmatmul.mubr.msk.f32.vlgmr.msra.gmra.mrb[6].mxu0 %vm429_vm4, %v898_v10  ;;  %1756 = vmatprep.subr.bf16.mxu0 %v2453_v36 }
 0x1b6   : > { %1764 = vmatprep.subr.bf16.mxu1 %v2457_v38  ;;  %1613 = vmatmul.mubr.msk.f32.vlgmr.msra.gmra.mrb[6].mxu1 %vm429_vm4, %v898_v10 }
 0x1b7   : > { %1758 = vmatpush1.bf16.msra.mxu0 %v2455_v37  ;;  %1766 = vmatpush1.bf16.msra.mxu1 %v2451_v35 }
 0x1b8   : > { %1760 = vmatprep.subr.bf16.mxu0 %v2467_v60  ;;  %1768 = vmatprep.subr.bf16.mxu1 %v2469_v61 }
 0x1b9   : > { %1130 = vmatprep.mubr.f32.mxu0 %v2175_v21  ;;  %1201 = vmatprep.mubr.f32.mxu1 %v2175_v21 }
 0x1bb   : > { %1762 = vmatpush1.bf16.msra.mxu0 %v2465_v59  ;;  %1770 = vmatpush1.bf16.msra.mxu1 %v2471_v62 }
 0x1bc   : > { %1074 = vmatprep.subr.mxu0 %v2478_v3  ;;  %1145 = vmatprep.subr.mxu1 %v2482_v5 }
 0x1bf   : > { %1075 = vmatpush1.msra.mxu0 %v2484_v7  ;;  %1146 = vmatpush1.msra.mxu1 %v2480_v4 }
 0x1c0   : > { %1614 = vmatmul.mubr.msk.f32.vlgmr.msra.gmra.mrb[8].mxu0 %vm429_vm4, %v1062_v11  ;;  %1615 = vmatmul.mubr.msk.f32.vlgmr.msra.gmra.mrb[8].mxu1 %vm429_vm4, %v1062_v11 }
 0x267   : > { %v499_v12 = vpop.f32.mrb[0].mxu0 }
 0x268   : > { %575 = vrot.lane.b32.xlu1 %v499_v12, %s2178_s9  ;;  %v501_v13 = vpop.f32.mrb[1].mxu0  ;;  %v570_v14 = vpop.f32.mrb[0].mxu1 }
 0x269   : > { %577 = vrot.lane.b32.xlu0 %v501_v13, %s2178_s9  ;;  %v572_v15 = vpop.f32.mrb[1].mxu1 }
 0x26c   : > { %579 = vrot.lane.b32.xlu1 %v570_v14, %s2178_s9 }
 0x26d   : > { %581 = vrot.lane.b32.xlu0 %v572_v15, %s2178_s9 }
 0x272   : > { %v657_v16 = vpop.f32.mrb[2].mxu0 }
 0x273   : > { %v659_v17 = vpop.f32.mrb[3].mxu0  ;;  %v728_v18 = vpop.f32.mrb[2].mxu1 }
 0x274   : > { %v730_v19 = vpop.f32.mrb[3].mxu1 }
 0x27d   : > { %v804_v20 = vpop.f32.mrb[4].mxu0 }
 0x27e   : > { %880 = vrot.lane.b32.xlu1 %v804_v20, %s2179_s20  ;;  %v806_v21 = vpop.f32.mrb[5].mxu0  ;;  %v875_v22 = vpop.f32.mrb[4].mxu1 }
 0x27f   : > { %882 = vrot.lane.b32.xlu0 %v806_v21, %s2179_s20  ;;  %v877_v23 = vpop.f32.mrb[5].mxu1 }
 0x282   : > { %884 = vrot.lane.b32.xlu1 %v875_v22, %s2179_s20  ;;  %v1287_v22 = vld [vmem:[#allocation8 + $0x80] sm:$0xff] }
 0x283   : > { %886 = vrot.lane.b32.xlu0 %v877_v23, %s2179_s20  ;;  %v1288_v23 = vld [vmem:[#allocation8 + $0x88] sm:$0xff] }
 0x288   : > { %v968_v25 = vpop.f32.mrb[6].mxu0 }
 0x289   : > { %1044 = vrot.lane.b32.xlu0 %v968_v25, %s2180_s8  ;;  %v970_v26 = vpop.f32.mrb[7].mxu0  ;;  %v1039_v27 = vpop.f32.mrb[6].mxu1  ;;  %v1319_v25 = vld [vmem:[#allocation8 + $0x180] sm:$0xff] }
 0x28a   : > { %1046 = vrot.lane.b32.xlu1 %v970_v26, %s2180_s8  ;;  %v1041_v28 = vpop.f32.mrb[7].mxu1 }
 0x28d   : > { %1048 = vrot.lane.b32.xlu0 %v1039_v27, %s2180_s8 }
 0x28e   : > { %1050 = vrot.lane.b32.xlu1 %v1041_v28, %s2180_s8  ;;  %v1771_v28 = vpack.c.bf16 %v1288_v23, %v1287_v22  ;;  %v1279_v22 = vld [vmem:[#allocation8 + $0x40] sm:$0xff]  ;;  %v1280_v23 = vld [vmem:[#allocation8 + $0x48] sm:$0xff] }
 0x290   : > { %1772 = vmatprep.subr.bf16.mxu0 %v1771_v28 }
 0x293   : > { %v1132_v29 = vpop.f32.mrb[8].mxu0  ;;  %v1203_v30 = vpop.f32.mrb[8].mxu1 }
 0x294   : > { %1208 = vrot.lane.b32.xlu0 %v1132_v29, %s2181_s29  ;;  %v1134_v31 = vpop.f32.mrb[9].mxu0  ;;  %v1205_v32 = vpop.f32.mrb[9].mxu1  ;;  %v1320_v29 = vld [vmem:[#allocation8 + $0x188] sm:$0xff] }
 0x295   : > { %1210 = vrot.lane.b32.xlu1 %v1134_v31, %s2181_s29  ;;  %v1272_v31 = vld [vmem:[#allocation8 + $0x8] sm:$0xff] }
 0x298   : > { %1212 = vrot.lane.b32.xlu0 %v1203_v30, %s2181_s29  ;;  %v1271_v30 = vld [vmem:[#allocation8] sm:$0xff] }
 0x299   : > { %1214 = vrot.lane.b32.xlu1 %v1205_v32, %s2181_s29 }
 0x2da   : > { %v576_v35 = vpop.permute.xlu1 %575 }
 0x2db   : > { %v578_v34 = vpop.permute.xlu0 %577 }
 0x2dc   : > { %v586_v44 = vsel %vm583_vm5, %v576_v35, %v578_v34 }
 0x2dd   : > { %v658_v47 = vadd.f32 %v657_v16, %v586_v44 }
 0x2de   : > { %v580_v37 = vpop.permute.xlu1 %579 }
 0x2df   : > { %v582_v36 = vpop.permute.xlu0 %581  ;;  %v585_v48 = vsel %vm583_vm5, %v578_v34, %v580_v37 }
 0x2e0   : > { %v584_v50 = vsel %vm583_vm5, %v580_v37, %v582_v36  ;;  %v587_v51 = vsel %vm583_vm5, %v582_v36, %v576_v35  ;;  %v660_v55 = vadd.f32 %v659_v17, %v585_v48  ;;  %v1803_v35 = vpack.c.bf16 %v1320_v29, %v1319_v25  ;;  %v1303_v37 = vld [vmem:[#allocation8 + $0x100] sm:$0xff]  ;;  %v1274_v48 = vld [vmem:[#allocation8 + $0x18] sm:$0xff]  ;;  %v1312_v29 = vld [vmem:[#allocation8 + $0x148] sm:$0xff] }
 0x2e1   : > { %v729_v59 = vadd.f32 %v728_v18, %v584_v50  ;;  %v731_v60 = vadd.f32 %v730_v19, %v587_v51  ;;  %v1773_v36 = vpack.c.bf16 %v1272_v31, %v1271_v30  ;;  %v1306_v51 = vld [vmem:[#allocation8 + $0x118] sm:$0xff]  ;;  %v1311_v25 = vld [vmem:[#allocation8 + $0x140] sm:$0xff]  ;;  %v1297_v30 = vld [vmem:[#allocation8 + $0xd0] sm:$0xff] }
 0x2e2   : > { %1804 = vmatprep.subr.bf16.mxu1 %v1803_v35  ;;  %v1298_v31 = vld [vmem:[#allocation8 + $0xd8] sm:$0xff]  ;;  %v1329_v35 = vld [vmem:[#allocation8 + $0x1d0] sm:$0xff] }
 0x2e3   : > { %1774 = vmatpush3.bf16.msra.mxu0 %v1773_v36  ;;  %v1330_v36 = vld [vmem:[#allocation8 + $0x1d8] sm:$0xff] }
 0x2f0   : > { %v881_v39 = vpop.permute.xlu1 %880 }
 0x2f1   : > { %v883_v38 = vpop.permute.xlu0 %882 }
 0x2f2   : > { %v891_v45 = vsel %vm888_vm6, %v881_v39, %v883_v38 }
 0x2f3   : > { %v893_v53 = vadd.f32 %v891_v45, %v658_v47  ;;  %v1273_v47 = vld [vmem:[#allocation8 + $0x10] sm:$0xff] }
 0x2f4   : > { %v885_v41 = vpop.permute.xlu1 %884  ;;  %v1777_v50 = vpack.c.bf16 %v1274_v48, %v1273_v47  ;;  %v1332_v47 = vld [vmem:[#allocation8 + $0x1e8] sm:$0xff] }
 0x2f5   : > { %v887_v40 = vpop.permute.xlu0 %886  ;;  %v890_v54 = vsel %vm888_vm6, %v883_v38, %v885_v41  ;;  %v1289_v38 = vld [vmem:[#allocation8 + $0x90] sm:$0xff] }
 0x2f6   : > { %v889_v56 = vsel %vm888_vm6, %v885_v41, %v887_v40  ;;  %v892_v57 = vsel %vm888_vm6, %v887_v40, %v881_v39  ;;  %v894_v0 = vadd.f32 %v890_v54, %v660_v55  ;;  %v1290_v41 = vld [vmem:[#allocation8 + $0x98] sm:$0xff] }
 0x2f7   : > { %v895_v4 = vadd.f32 %v889_v56, %v729_v59  ;;  %v896_v5 = vadd.f32 %v892_v57, %v731_v60  ;;  %v1775_v45 = vpack.c.bf16 %v1290_v41, %v1289_v38  ;;  %v1323_v56 = vld [vmem:[#allocation8 + $0x1a0] sm:$0xff]  ;;  %v1324_v57 = vld [vmem:[#allocation8 + $0x1a8] sm:$0xff]  ;;  %v1791_v38 = vpack.c.bf16 %v1298_v31, %v1297_v30  ;;  %v1313_v41 = vld [vmem:[#allocation8 + $0x150] sm:$0xff] }
 0x2f8   : > { %v1811_v59 = vpack.c.bf16 %v1324_v57, %v1323_v56  ;;  %v1276_v60 = vld [vmem:[#allocation8 + $0x28] sm:$0xff] }
 0x2f9   : > { %1776 = vmatprep.subr.bf16.mxu0 %v1775_v45  ;;  %v1300_v45 = vld [vmem:[#allocation8 + $0xe8] sm:$0xff] }
 0x2fa   : > { %1778 = vmatpush3.bf16.msra.mxu0 %v1777_v50 }
 0x2fb   : > { %v1045_v42 = vpop.permute.xlu0 %1044 }
 0x2fc   : > { %v1047_v43 = vpop.permute.xlu1 %1046 }
 0x2fd   : > { %v1055_v52 = vsel %vm1052_vm7, %v1045_v42, %v1047_v43 }
 0x2fe   : > { %v1057_v61 = vadd.f32 %v1055_v52, %v893_v53  ;;  %v1291_v52 = vld [vmem:[#allocation8 + $0xa0] sm:$0xff]  ;;  %v1292_v53 = vld [vmem:[#allocation8 + $0xa8] sm:$0xff] }
 0x2ff   : > { %v1049_v46 = vpop.permute.xlu0 %1048  ;;  %v1779_v55 = vpack.c.bf16 %v1292_v53, %v1291_v52  ;;  %v1284_v52 = vld [vmem:[#allocation8 + $0x68] sm:$0xff] }
 0x300   : > { %v1051_v49 = vpop.permute.xlu1 %1050  ;;  %v1054_v62 = vsel %vm1052_vm7, %v1047_v43, %v1049_v46  ;;  %v1322_v43 = vld [vmem:[#allocation8 + $0x198] sm:$0xff] }
 0x301   : > { %v1053_v1 = vsel %vm1052_vm7, %v1049_v46, %v1051_v49  ;;  %v1056_v2 = vsel %vm1052_vm7, %v1051_v49, %v1045_v42  ;;  %v1058_v7 = vadd.f32 %v1054_v62, %v894_v0  ;;  %v1321_v42 = vld [vmem:[#allocation8 + $0x190] sm:$0xff]  ;;  %v1308_v62 = vld [vmem:[#allocation8 + $0x128] sm:$0xff]  ;;  %1780 = vmatprep.subr.bf16.mxu0 %v1779_v55 }
 0x302   : > { %v1059_v9 = vadd.f32 %v1053_v1, %v895_v4  ;;  %v1060_v10 = vadd.f32 %v1056_v2, %v896_v5  ;;  %v1807_v46 = vpack.c.bf16 %v1322_v43, %v1321_v42  ;;  %v1305_v49 = vld [vmem:[#allocation8 + $0x110] sm:$0xff]  ;;  %v1294_v1 = vld [vmem:[#allocation8 + $0xb8] sm:$0xff]  ;;  %v1823_v42 = vpack.c.bf16 %v1330_v36, %v1329_v35  ;;  %v1316_v55 = vld [vmem:[#allocation8 + $0x168] sm:$0xff] }
 0x303   : > { %v1809_v54 = vpack.c.bf16 %v1306_v51, %v1305_v49  ;;  %v1293_v0 = vld [vmem:[#allocation8 + $0xb0] sm:$0xff]  ;;  %v1326_v5 = vld [vmem:[#allocation8 + $0x1b8] sm:$0xff]  ;;  %v1283_v51 = vld [vmem:[#allocation8 + $0x60] sm:$0xff] }
 0x304   : > { %v1325_v2 = vld [vmem:[#allocation8 + $0x1b0] sm:$0xff]  ;;  %v1783_v4 = vpack.c.bf16 %v1294_v1, %v1293_v0  ;;  %v1314_v43 = vld [vmem:[#allocation8 + $0x158] sm:$0xff]  ;;  %v1797_v56 = vpack.c.bf16 %v1284_v52, %v1283_v51 }
 0x305   : > { %v1825_v49 = vpack.c.bf16 %v1314_v43, %v1313_v41  ;;  %v1286_v0 = vld [vmem:[#allocation8 + $0x78] sm:$0xff] }
 0x306   : > { %v1209_v58 = vpop.permute.xlu0 %1208 }
 0x307   : > { %v1211_v63 = vpop.permute.xlu1 %1210 }
 0x308   : > { %v1219_v3 = vsel %vm1216_vm8, %v1209_v58, %v1211_v63 }
 0x309   : > { %v1221_v6 = vadd.f32 %v1219_v3, %v1057_v61  ;;  %v1307_v61 = vld [vmem:[#allocation8 + $0x120] sm:$0xff] }
 0x30a   : > { %v1213_v8 = vpop.permute.xlu0 %1212  ;;  %v1813_v3 = vpack.c.bf16 %v1308_v62, %v1307_v61  ;;  %v1334_v62 = vld [vmem:[#allocation8 + $0x1f8] sm:$0xff] }
 0x30b   : > { %v1218_v11 = vsel %vm1216_vm8, %v1211_v63, %v1213_v8  ;;  %v1215_v12 = vpop.permute.xlu1 %1214  ;;  %v2592_v13 = vadd.f32 %v1229_v33, %v1221_v6  ;;  %v1277_v6 = vld [vmem:[#allocation8 + $0x30] sm:$0xff] }
 0x30c   : > { %v1222_v14 = vadd.f32 %v1218_v11, %v1058_v7  ;;  %v1217_v15 = vsel %vm1216_vm8, %v1213_v8, %v1215_v12  ;;  %v1220_v16 = vsel %vm1216_vm8, %v1215_v12, %v1209_v58  ;;  %v1275_v58 = vld [vmem:[#allocation8 + $0x20] sm:$0xff]  ;;  %v1278_v7 = vld [vmem:[#allocation8 + $0x38] sm:$0xff]  ;;  %v1815_v8 = vpack.c.bf16 %v1326_v5, %v1325_v2  ;;  %v1296_v12 = vld [vmem:[#allocation8 + $0xc8] sm:$0xff] }
 0x30d   : > { %v1223_v17 = vadd.f32 %v1217_v15, %v1059_v9  ;;  %v1224_v18 = vadd.f32 %v1220_v16, %v1060_v10  ;;  %v1235_v26 = vmax.f32 %v2592_v13, 0.0  ;;  %v1781_v63 = vpack.c.bf16 %v1276_v60, %v1275_v58  ;;  %v1309_v9 = vld [vmem:[#allocation8 + $0x130] sm:$0xff]  ;;  %v1310_v10 = vld [vmem:[#allocation8 + $0x138] sm:$0xff]  ;;  %v1295_v11 = vld [vmem:[#allocation8 + $0xc0] sm:$0xff] }
 0x30e   : > { %v2598_v19 = vadd.f32 %v1229_v33, %v1222_v14  ;;  %v1327_v14 = vld [vmem:[#allocation8 + $0x1c0] sm:$0xff]  ;;  %v1328_v15 = vld [vmem:[#allocation8 + $0x1c8] sm:$0xff]  ;;  %v1785_v16 = vpack.c.bf16 %v1278_v7, %v1277_v6  ;;  %v1301_v58 = vld [vmem:[#allocation8 + $0xf0] sm:$0xff] }
 0x30f   : > { %v2600_v20 = vadd.f32 %v1229_v33, %v1223_v17  ;;  %v2602_v21 = vadd.f32 %v1229_v33, %v1224_v18  ;;  %v1304_v33 = vld [vmem:[#allocation8 + $0x108] sm:$0xff]  ;;  %1782 = vmatpush3.bf16.msra.mxu0 %v1781_v63  ;;  %v1817_v17 = vpack.c.bf16 %v1310_v10, %v1309_v9  ;;  %v1787_v18 = vpack.c.bf16 %v1296_v12, %v1295_v11  ;;  %v1333_v60 = vld [vmem:[#allocation8 + $0x1f0] sm:$0xff] }
 0x310   : > { %v1236_v27 = vmax.f32 %v2598_v19, 0.0  ;;  %v1805_v40 = vpack.c.bf16 %v1304_v33, %v1303_v37  ;;  %1784 = vmatprep.subr.bf16.mxu0 %v1783_v4  ;;  %v1819_v28 = vpack.c.bf16 %v1328_v15, %v1327_v14  ;;  %v1789_v37 = vpack.c.bf16 %v1280_v23, %v1279_v22  ;;  %v1285_v63 = vld [vmem:[#allocation8 + $0x70] sm:$0xff]  ;;  %v1318_v4 = vld [vmem:[#allocation8 + $0x178] sm:$0xff] }
 0x311   : > { %v1237_v32 = vmax.f32 %v2600_v20, 0.0  ;;  %v1238_v34 = vmax.f32 %v2602_v21, 0.0  ;;  %v1821_v33 = vpack.c.bf16 %v1312_v29, %v1311_v25  ;;  %v1831_v1 = vpack.c.bf16 %v1334_v62, %v1333_v60 }
 0x312   : > { %v1956_v39 = vpack.i.bf16 %v1236_v27, %v1235_v26  ;;  %1806 = vmatpush3.bf16.msra.mxu1 %v1805_v40  ;;  %v1282_v40 = vld [vmem:[#allocation8 + $0x58] sm:$0xff]  ;;  %v1801_v2 = vpack.c.bf16 %v1286_v0, %v1285_v63 }
 0x313   : > { %v1961_v44 = vpack.i.bf16 %v1238_v34, %v1237_v32  ;;  %1808 = vmatprep.subr.bf16.mxu1 %v1807_v46  ;;  %1786 = vmatpush3.bf16.msra.mxu0 %v1785_v16  ;;  %v1331_v46 = vld [vmem:[#allocation8 + $0x1e0] sm:$0xff] }
 0x314   : > { %1957 = vrot.lane.b32.xlu0 %v1956_v39, %s2178_s9  ;;  %1788 = vmatprep.subr.bf16.mxu0 %v1787_v18  ;;  %v1281_v39 = vld [vmem:[#allocation8 + $0x50] sm:$0xff]  ;;  %v1827_v53 = vpack.c.bf16 %v1332_v47, %v1331_v46 }
 0x315   : > { %1962 = vrot.lane.b32.xlu1 %v1961_v44, %s2178_s9  ;;  %v1299_v44 = vld [vmem:[#allocation8 + $0xe0] sm:$0xff]  ;;  %v1793_v48 = vpack.c.bf16 %v1282_v40, %v1281_v39  ;;  %s2096_s9 = scalar_lea.vmem %s2095_s16, 256 }
 0x316   : > { %1810 = vmatpush3.bf16.msra.mxu1 %v1809_v54  ;;  %v1795_v50 = vpack.c.bf16 %v1300_v45, %v1299_v44  ;;  %v1315_v54 = vld [vmem:[#allocation8 + $0x160] sm:$0xff]  ;;  %p2098_p1 = scmp.lt.s32.totalorder %s2096_s9, %s2090_s30 }
 0x317   : > { %1812 = vmatprep.subr.bf16.mxu1 %v1811_v59  ;;  %1790 = vmatpush3.bf16.msra.mxu0 %v1789_v37  ;;  %v1829_v57 = vpack.c.bf16 %v1316_v55, %v1315_v54  ;;  %v1302_v59 = vld [vmem:[#allocation8 + $0xf8] sm:$0xff] }
 0x318   : > { %1792 = vmatprep.subr.bf16.mxu0 %v1791_v38  ;;  %v1799_v61 = vpack.c.bf16 %v1302_v59, %v1301_v58  ;;  %p2099_p2 = por %p2098_p1, %p2097_p12 }
 0x31a   : > { %1814 = vmatpush3.bf16.msra.mxu1 %v1813_v3  ;;  %v1317_v3 = vld [vmem:[#allocation8 + $0x170] sm:$0xff]  ;;  %p2100_p4 = pnand %p2099_p2, %p2093_p7 }
 0x31b   : > { %1816 = vmatprep.subr.bf16.mxu1 %v1815_v8  ;;  %1794 = vmatpush3.bf16.msra.mxu0 %v1793_v48  ;;  %v1833_v5 = vpack.c.bf16 %v1318_v4, %v1317_v3 }
 0x31c   : > { %1796 = vmatprep.subr.bf16.mxu0 %v1795_v50 }
 0x31e   : > { %1818 = vmatpush3.bf16.msra.mxu1 %v1817_v17 }
 0x31f   : > { %1820 = vmatprep.subr.bf16.mxu1 %v1819_v28  ;;  %1798 = vmatpush3.bf16.msra.mxu0 %v1797_v56 }
 0x320   : > { %1800 = vmatprep.subr.bf16.mxu0 %v1799_v61 }
 0x322   : > { %1822 = vmatpush3.bf16.msra.mxu1 %v1821_v33 }
 0x323   : > { %1824 = vmatprep.subr.bf16.mxu1 %v1823_v42  ;;  %1802 = vmatpush3.bf16.msra.mxu0 %v1801_v2 }
 0x326   : > { %1826 = vmatpush3.bf16.msra.mxu1 %v1825_v49 }
 0x327   : > { %1828 = vmatprep.subr.bf16.mxu1 %v1827_v53 }
 0x32a   : > { %1830 = vmatpush3.bf16.msra.mxu1 %v1829_v57 }
 0x32b   : > { %1832 = vmatprep.subr.bf16.mxu1 %v1831_v1 }
 0x32e   : > { %1834 = vmatpush3.bf16.msra.mxu1 %v1833_v5 }
 0x386   : > { %v1958_v6 = vpop.permute.xlu0 %1957 }
 0x387   : > { %v1960_v7 = vunpack.i.h.bf16 %v1958_v6  ;;  %v1959_v8 = vunpack.i.l.bf16 %v1958_v6  ;;  %v1963_v9 = vpop.permute.xlu1 %1962 }
 0x388   : > { %v1965_v10 = vunpack.i.h.bf16 %v1963_v9  ;;  %v1964_v11 = vunpack.i.l.bf16 %v1963_v9 }
 0x389   : > { %v1249_v12 = vsel %vm583_vm5, %v1959_v8, %v1960_v7 }
 0x38a   : > { %v1247_v14 = vsel %vm583_vm5, %v1964_v11, %v1965_v10  ;;  %v1248_v15 = vsel %vm583_vm5, %v1960_v7, %v1964_v11  ;;  %v1250_v16 = vsel %vm583_vm5, %v1965_v10, %v1959_v8  ;;  %v1251_v17 = vmax.f32 %v1235_v26, %v1249_v12 }
 0x38b   : > { %v1253_v18 = vmax.f32 %v1237_v32, %v1247_v14  ;;  %v1254_v22 = vmax.f32 %v1238_v34, %v1250_v16  ;;  %v1252_v23 = vmax.f32 %v1236_v27, %v1248_v15 }
 0x38d   : > { %v1971_v25 = vpack.i.bf16 %v1254_v22, %v1253_v18  ;;  %v1966_v28 = vpack.i.bf16 %v1252_v23, %v1251_v17 }
 0x38f   : > { %1972 = vrot.lane.b32.xlu1 %v1971_v25, %s2173_s27  ;;  %1967 = vrot.lane.b32.xlu0 %v1966_v28, %s2173_s27 }
 0x401   : > { %v1973_v29 = vpop.permute.xlu1 %1972  ;;  %v1968_v30 = vpop.permute.xlu0 %1967 }
 0x402   : > { %v1975_v31 = vunpack.i.h.bf16 %v1973_v29  ;;  %v1974_v13 = vunpack.i.l.bf16 %v1973_v29  ;;  %v1970_v26 = vunpack.i.h.bf16 %v1968_v30  ;;  %v1969_v20 = vunpack.i.l.bf16 %v1968_v30 }
 0x404   : > { %v1263_v21 = vsel %vm346_vm0, %v1974_v13, %v1975_v31  ;;  %v1265_v19 = vsel %vm346_vm0, %v1969_v20, %v1970_v26  ;;  %v1264_v27 = vsel %vm346_vm0, %v1970_v26, %v1974_v13  ;;  %v1266_v32 = vsel %vm346_vm0, %v1975_v31, %v1969_v20 }
 0x405   : > { %v1269_v34 = vmax.f32 %v1253_v18, %v1263_v21  ;;  %v1267_v35 = vmax.f32 %v1251_v17, %v1265_v19  ;;  %v1268_v36 = vmax.f32 %v1252_v23, %v1264_v27  ;;  %v1270_v37 = vmax.f32 %v1254_v22, %v1266_v32 }
 0x407   : > { %1399 = vmatprep.mubr.f32.mxu0 %v1268_v36  ;;  %1469 = vmatprep.mubr.f32.mxu1 %v1270_v37 }
 0x408   : > { %1400 = vmatmul.mubr.f32.vlgmr.msra.gmra.mrb[10].mxu0 %v1267_v35  ;;  %1470 = vmatmul.mubr.f32.vlgmr.msra.gmra.mrb[10].mxu1 %v1269_v34 }
 0x4db   : > { %v1653_v33 = vpop.f32.mrb[10].mxu0  ;;  %v1688_v38 = vpop.f32.mrb[10].mxu1 }
 0x4dc   : > { %v1654_v39 = vpop.f32.mrb[11].mxu0  ;;  %v1689_v40 = vpop.f32.mrb[11].mxu1 }
 0x4dd   : > { %v1655_v24 = vadd.f32 %v1654_v39, %v1653_v33  ;;  %v1690_v41 = vadd.f32 %v1689_v40, %v1688_v38 }
 0x4df   : > { %v1472_v42 = vadd.f32 %v1690_v41, %v1655_v24 }
 0x4e1   : > { %1475 = vst [vmem:[%s309_s10] sm:$0xff] %v1472_v42 }
 0x4e2   : > { %2103 = shalt.err (!%p2100_p4)
}
 0x4e3   : > { %s2104_s7 = scalar_lea.hbm %s2649_s17, 128  ;;  %s2108_s29 = scalar_lea.hbm %s2699_s6, 256 }
 0x4e4   : > { %p2105_p0 = scmp.ne.s32.totalorder %s2649_s17, %s2104_s7  ;;  %p2109_p13 = scmp.lt.u32.totalorder %s2649_s17, %s2699_s6 }
 0x4e5   : > { %p2110_p6 = scmp.lt.u32.totalorder %s2108_s29, %s2104_s7  ;;  %p2112_p10 = scmp.lt.u32.totalorder %s2104_s7, %s2649_s17 }
 0x4e6   : > { %p2106_p9 = pnand %p2105_p0, %p2369_p5 }
 0x4e7   : > { %p2111_p11 = por %p2110_p6, %p2109_p13 }
 0x4e8   : > { %p2107_p8 = pneg %p2106_p9 }
 0x4e9   : > { %p2113_p3 = por %p2112_p10, %p2111_p11 }
 0x4eb   : > { %p2114_p7 = pnand %p2113_p3, %p2107_p8 }
 0x4ed   : > { %2117 = shalt.err (!%p2114_p7)
}
 0x4ee   : > { %1849 = dma.vmem_to_hbm [thread:$0]  (%p2369_p5), %s2651_s11, 128, %s2649_s17, %s1477_s12  }
 0x4ef PF: > { %s1502_s10 = sand.u32 1, %s2152_s21   ;;  %p2717_p12 = scmp.ne.s32.totalorder %s2704_s28, 0 }
 0x4f0   : > { %p2718_p1 = scmp.ge.s32.totalorder %s2164_s24, 2  ;;  %s1503_s27 = scalar_lea.sflag [#allocation5], %s1502_s10 }
 0x4f2   : > { %p1866_p2 = pnand %p2718_p1, %p2717_p12 }
 0x4f4   : > { %2147 = dma.done.wait (!%p1866_p2), %s1503_s27, 128  }
 0x4f5   : > { %2149 = vsyncadd (!%p1866_p2), %s1503_s27, 4294967168  ;;  %p21_p4 = scmp.ge.s32.totalorder %s2355_s18, 4   ;;  %s2719_s21 = smov %s2156_s22 }
 0x4f6   : > { %s2720_s22 = smov %s2160_s23  ;;  %s2721_s23 = smov %s2365_s14 }
 0x4f7   : > { %s2722_s24 = smov %s2355_s18  ;;  %23 = sbr.rel (!%p21_p4) target bundleno = 7 (0x7), region = 106 }
 0x4fe   :  { %1508 = vsyncpa [#allocation4], 1 }
 0x4ff   :  { %1510 = vsyncpa [#allocation4 + $0x1], 1 }
 0x500   :  { %1511 = vsyncpa [#allocation7], 1 }
 0x501   :  { %1512 = vsyncpa [#allocation10], 1 }
 0x502   :  { %1514 = vsyncpa [#allocation10 + $0x1], 1 }
 0x503   :  { %1515 = vsyncpa [#allocation5], 1 }
 0x504   :  { %1517 = vsyncpa [#allocation5 + $0x1], 1 }

</bundles_post_ra>
